<compile_context>
chip_gen: v7x
topology: tpu7x:2x2x1
jax: 0.10.0
libtpu: 0.0.40
codegen_flags: <defaults>
</compile_context>

<pallas_src>
import jax
import jax.numpy as jnp
from jax.experimental import pallas as pl
from jax.experimental.pallas import tpu as pltpu

_FAST_PATH_MAX_BYTES = 18 * 1024 * 1024   # resident fast path if p+t+m fit
_BLOCK_BYTES_RESIDENT = 4 * 1024 * 1024   # per-step block budget (all 3 inputs)
_BLOCK_BYTES_STREAM = 8 * 1024 * 1024
_VMEM_LIMIT_BYTES = 32 * 1024 * 1024      # < 64 MiB physical on v7x, fine on v5e/v6e


def _col_sums(x):
    """(R, W) f32 -> (1, W) column partial sums.

    Two-level: VALU-only adds of 8-row slabs first (keeps the sequential
    accumulation depth ~R/8 for f32 accuracy), then one cheap sublane reduce.
    """
    r = x.shape[0]
    if r % 8 == 0 and r > 8:
        x = x.reshape(r // 8, 8, x.shape[1]).sum(axis=0)
    return jnp.sum(x, axis=0, keepdims=True)


def _make_ssi_kernel(H, W, bh, nt, resident):
    """Builds the 2-phase kernel. grid = (phase, row_tile), both sequential."""
    ragged = (H % bh) != 0
    last = nt - 1

    def kernel(p_ref, t_ref, m_ref, loss_ref, acc_ref, ss_ref, *save_refs):
        # p_ref/t_ref: (bh, W) float tiles; m_ref: (bh, W) bool tile.
        # loss_ref: (1, 1) f32 SMEM output.
        # acc_ref:  (6, 1, W) f32 VMEM scratch - rows 0..4 hold the five
        #           normal-equation partial sums, row 5 the masked-L1 sum.
        # ss_ref:   (2,) f32 SMEM scratch - [scale, shift].
        # save_refs (resident only): (nt, bh, W) full-image VMEM parking for
        #           prediction / target / combined-validity mask (int8).
        phase = pl.program_id(0)
        tile = pl.program_id(1)

        def tile_valid_mask():
            m = m_ref[...]
            if not ragged:
                return m
            rows = jax.lax.broadcasted_iota(jnp.int32, (bh, W), 0)
            return jnp.logical_and(m, rows + tile * bh < H)

        @pl.when(jnp.logical_and(phase == 0, tile == 0))
        def _init():
            acc_ref[...] = jnp.zeros_like(acc_ref)

        # ---- phase 0: accumulate the five normal-equation sums --------------
        @pl.when(phase == 0)
        def _normal_equation_sums():
            p = p_ref[...].astype(jnp.float32)
            t = t_ref[...].astype(jnp.float32)
            valid = tile_valid_mask()
            # Masked copies; products only use masked values so garbage in the
            # padded rows of a partial last tile can never produce NaN * 0.
            mp = jnp.where(valid, p, 0.0)
            mt = jnp.where(valid, t, 0.0)
            mf = jnp.where(valid, 1.0, 0.0)
            acc_ref[0] += _col_sums(mp * mp)   # a00 = sum(m * p * p)  (m is 0/1)
            acc_ref[1] += _col_sums(mp)        # a01 = sum(m * p)
            acc_ref[2] += _col_sums(mf)        # a11 = sum(m)
            acc_ref[3] += _col_sums(mp * mt)   # b0  = sum(m * p * t)
            acc_ref[4] += _col_sums(mt)        # b1  = sum(m * t)
            if resident:
                p_save, t_save, m_save = save_refs
                p_save[tile] = p_ref[...]
                t_save[tile] = t_ref[...]
                m_save[tile] = valid.astype(jnp.int8)

        # ---- end of phase 0: solve into SMEM scalars (centered form) --------
        @pl.when(jnp.logical_and(phase == 0, tile == last))
        def _solve():
            # TODO(synk): PyTorch does the solve (and sums) in float64; TPU
            # Pallas has no f64, so this is f32 - the centered formulation is
            # well conditioned (no a00*a11 - a01^2 cancellation).
            a00 = jnp.sum(acc_ref[0])
            a01 = jnp.sum(acc_ref[1])
            a11 = jnp.sum(acc_ref[2])
            b0 = jnp.sum(acc_ref[3])
            b1 = jnp.sum(acc_ref[4])
            has_pts = a11 > 0.0
            inv_n = jnp.where(has_pts, 1.0, 0.0) / jnp.where(has_pts, a11, 1.0)
            var = a00 - a01 * a01 * inv_n      # sum m (p - mean_p)^2
            cov = b0 - a01 * b1 * inv_n        # sum m (p - mean_p)(t - mean_t)
            valid = jnp.logical_and(has_pts, var > 0.0)   # == (det > 0)
            scale = jnp.where(valid, cov, 0.0) / jnp.where(valid, var, 1.0)
            shift = jnp.where(valid, (b1 - scale * a01) * inv_n, 0.0)
            ss_ref[0] = scale
            ss_ref[1] = shift

        # ---- phase 1: masked L1 with the solved scale/shift ------------------
        @pl.when(phase == 1)
        def _masked_l1():
            if resident:
                p_save, t_save, m_save = save_refs
                p = p_save[tile].astype(jnp.float32)
                t = t_save[tile].astype(jnp.float32)
                valid = m_save[tile] != 0
            else:
                p = p_ref[...].astype(jnp.float32)
                t = t_ref[...].astype(jnp.float32)
                valid = tile_valid_mask()
            r = ss_ref[0] * p + ss_ref[1] - t
            acc_ref[5] += _col_sums(jnp.where(valid, jnp.abs(r), 0.0))

        # ---- final: normalize and emit the scalar loss ------------------------
        @pl.when(jnp.logical_and(phase == 1, tile == last))
        def _finalize():
            denom = jnp.sum(acc_ref[2])        # sum(mask)
            num = jnp.sum(acc_ref[5])
            # Empty mask => 0/0 = NaN, matching F.l1_loss on an empty select.
            loss_ref[0, 0] = num / denom

    return kernel


def ssi_loss(prediction, target, mask, *, block_rows=None, resident=None):
    """Scale-and-shift-invariant L1 depth loss (ZoeDepth SSILoss).

    prediction/target: float arrays squeezing to (H, W); mask: bool-ish of the
    same shape. Implements the batch==1, equal-spatial-shape path of the
    PyTorch module.
    """
    # TODO(synk): the PyTorch branch that bilinearly resizes `prediction`
    # (F.interpolate, align_corners=True) when spatial shapes differ is not
    # implemented; prediction and target must already share spatial shape.
    p = jnp.squeeze(prediction)
    t = jnp.squeeze(target)
    m = jnp.squeeze(mask)
    assert p.ndim == 2 and p.shape == t.shape == m.shape, (
        f"Shape mismatch: {p.shape} vs {t.shape} vs {m.shape}")

    # Keep f32/bf16 in HBM as-is (no wrapper copies); anything else -> f32.
    if p.dtype not in (jnp.float32, jnp.bfloat16):
        p = p.astype(jnp.float32)
    if t.dtype not in (jnp.float32, jnp.bfloat16):
        t = t.astype(jnp.float32)
    if m.dtype != jnp.bool_:
        m = m != 0                       # bool mask, 1 byte/elem

    H, W = p.shape
    bpe = p.dtype.itemsize + t.dtype.itemsize + 1
    if resident is None:
        resident = H * W * bpe <= _FAST_PATH_MAX_BYTES

    if block_rows is None:
        budget = _BLOCK_BYTES_RESIDENT if resident else _BLOCK_BYTES_STREAM
        block_rows = max(8, (budget // (W * bpe)) // 8 * 8)
    bh = min(int(block_rows), H)
    if bh < H:
        bh = max(8, (bh // 8) * 8)       # BlockSpec needs 8 | bh unless bh == H
    nt = pl.cdiv(H, bh)

    kernel = _make_ssi_kernel(H, W, bh, nt, resident)

    if resident:
        def idx_map(ph, i):
            # Phase 0 streams row-tiles; phase 1 reads only the VMEM save
            # buffers (keep requesting the last block so no extra DMA fires).
            return (i * (1 - ph) + (nt - 1) * ph, 0)
    else:
        def idx_map(ph, i):
            return (i, 0)

    in_spec = pl.BlockSpec((bh, W), idx_map)
    scratch = [
        pltpu.VMEM((6, 1, W), jnp.float32),   # 5 normal-eq sums + L1 sum
        pltpu.SMEM((2,), jnp.float32),        # [scale, shift]
    ]
    if resident:
        scratch += [
            pltpu.VMEM((nt, bh, W), p.dtype),
            pltpu.VMEM((nt, bh, W), t.dtype),
            pltpu.VMEM((nt, bh, W), jnp.int8),
        ]

    out = pl.pallas_call(
        kernel,
        out_shape=jax.ShapeDtypeStruct((1, 1), jnp.float32),
        grid_spec=pltpu.PrefetchScalarGridSpec(
            num_scalar_prefetch=0,
            grid=(2, nt),                     # (phase, row-tile), sequential
            in_specs=[in_spec, in_spec, in_spec],
            out_specs=pl.BlockSpec(memory_space=pltpu.MemorySpace.SMEM),
            scratch_shapes=scratch,
        ),
        compiler_params=pltpu.CompilerParams(
            dimension_semantics=("arbitrary", "arbitrary"),
            vmem_limit_bytes=_VMEM_LIMIT_BYTES,
        ),
    )(p, t, m)
    # TODO(synk): v7x has 2 TensorCores; sharding the row-tile axis across both
    # would need per-core partial sums plus a separate solve/finalize stage.
    return out[0, 0]


def _ref_loss(prediction, target, mask):
    """Pure-JAX reference mirroring the PyTorch forward (float32)."""
    p = jnp.squeeze(prediction).astype(jnp.float32)
    t = jnp.squeeze(target).astype(jnp.float32)
    m = jnp.squeeze(mask).astype(jnp.float32)
    a00 = jnp.sum(m * p * p)
    a01 = jnp.sum(m * p)
    a11 = jnp.sum(m)
    b0 = jnp.sum(m * p * t)
    b1 = jnp.sum(m * t)
    det = a00 * a11 - a01 * a01
    valid = det > 0
    safe = jnp.where(valid, det, 1.0)
    scale = jnp.where(valid, (a11 * b0 - a01 * b1) / safe, 0.0)
    shift = jnp.where(valid, (-a01 * b0 + a00 * b1) / safe, 0.0)
    err = jnp.abs(scale * p + shift - t)
    return jnp.sum(m * err) / a11


if __name__ == "__main__":
    key = jax.random.PRNGKey(0)
    k1, k2, k3 = jax.random.split(key, 3)

    # 1) Small NCHW input (module semantics: squeeze => batch == 1).
    B, C, H, W = 1, 1, 16, 16
    pred = jax.random.uniform(k1, (B, C, H, W), jnp.float32, 0.1, 2.0)
    noise = 0.05 * jax.random.normal(k2, (B, C, H, W), jnp.float32)
    tgt = 1.7 * pred + 0.3 + noise
    msk = jax.random.uniform(k3, (B, C, H, W)) > 0.2

    loss = ssi_loss(pred, tgt, msk)
    jax.block_until_ready(loss)
    ref = _ref_loss(pred, tgt, msk)
    assert jnp.allclose(loss, ref, rtol=1e-4, atol=1e-5), (float(loss), float(ref))

    # 2) Non-aligned spatial shape with several row tiles and a ragged last
    #    tile, through the resident (single-HBM-pass) fast path.
    k4, k5, k6 = jax.random.split(jax.random.PRNGKey(1), 3)
    H2, W2 = 100, 200
    pred2 = jax.random.uniform(k4, (1, 1, H2, W2), jnp.float32, 0.1, 5.0)
    tgt2 = 0.8 * pred2 - 0.1 + 0.02 * jax.random.normal(
        k5, (1, 1, H2, W2), jnp.float32)
    msk2 = jax.random.uniform(k6, (1, 1, H2, W2)) > 0.35
    loss2 = ssi_loss(pred2, tgt2, msk2, block_rows=24)
    jax.block_until_ready(loss2)
    ref2 = _ref_loss(pred2, tgt2, msk2)
    assert jnp.allclose(loss2, ref2, rtol=1e-4, atol=1e-5), (float(loss2), float(ref2))

    # 3) Same data through the streaming (two HBM passes) path with bf16 inputs.
    pred3 = pred2.astype(jnp.bfloat16)
    tgt3 = tgt2.astype(jnp.bfloat16)
    loss3 = ssi_loss(pred3, tgt3, msk2, block_rows=32, resident=False)
    jax.block_until_ready(loss3)
    ref3 = _ref_loss(pred3, tgt3, msk2)
    assert jnp.allclose(loss3, ref3, rtol=1e-3, atol=1e-3), (float(loss3), float(ref3))

    print("KERNEL_OK")
</pallas_src>

<mosaic_0001>
module attributes {stable_mosaic.version = 11 : i64} {
  func.func @kernel(%arg0: i32, %arg1: i32, %arg2: memref<16x16xf32, #tpu.memory_space<vmem>>, %arg3: memref<16x16xf32, #tpu.memory_space<vmem>>, %arg4: memref<16x16xi32, #tpu.memory_space<vmem>>, %arg5: memref<1x1xf32, #tpu.memory_space<smem>>, %arg6: memref<6x1x16xf32, #tpu.memory_space<vmem>>, %arg7: memref<2xf32, #tpu.memory_space<smem>>, %arg8: memref<1x16x16xf32, #tpu.memory_space<vmem>>, %arg9: memref<1x16x16xf32, #tpu.memory_space<vmem>>, %arg10: memref<1x16x16xi8, #tpu.memory_space<vmem>>) attributes {dimension_semantics = [#tpu.dimension_semantics<arbitrary>, #tpu.dimension_semantics<arbitrary>], iteration_bounds = array<i64: 2, 1>, scalar_prefetch = 0 : i64, scratch_operands = 5 : i64, tpu.core_type = #tpu.core_type<tc>, window_params = [{transform_indices = @transform_0, window_bounds = array<i64: 16, 16>}, {transform_indices = @transform_1, window_bounds = array<i64: 16, 16>}, {transform_indices = @transform_2, window_bounds = array<i64: 16, 16>}, {transform_indices = @transform_3, window_bounds = array<i64: 1, 1>}]} {
    %c0_i32 = arith.constant 0 : i32
    %0 = arith.cmpi eq, %arg0, %c0_i32 : i32
    %c0_i32_0 = arith.constant 0 : i32
    %1 = arith.cmpi eq, %arg1, %c0_i32_0 : i32
    %2 = arith.andi %0, %1 : i1
    %3 = arith.extui %2 : i1 to i32
    %c0_i32_1 = arith.constant 0 : i32
    %4 = arith.cmpi ne, %3, %c0_i32_1 : i32
    scf.if %4 {
      %cst = arith.constant 0.000000e+00 : f32
      %21 = vector.broadcast %cst : f32 to vector<6x1x16xf32>
      %c0 = arith.constant 0 : index
      %c0_11 = arith.constant 0 : index
      %c0_12 = arith.constant 0 : index
      %22 = vector.load %arg6[%c0, %c0_11, %c0_12] : memref<6x1x16xf32, #tpu.memory_space<vmem>>, vector<6x1x16xf32>
      tpu.vector_store %arg6[%c0, %c0_11, %c0_12], %21 {strides = array<i32>} : memref<6x1x16xf32, #tpu.memory_space<vmem>>, vector<6x1x16xf32>,
    } else {
    }
    %c0_i32_2 = arith.constant 0 : i32
    %5 = arith.cmpi eq, %arg0, %c0_i32_2 : i32
    %6 = arith.extui %5 : i1 to i32
    %c0_i32_3 = arith.constant 0 : i32
    %7 = arith.cmpi ne, %6, %c0_i32_3 : i32
    scf.if %7 {
      %c0 = arith.constant 0 : index
      %c0_11 = arith.constant 0 : index
      %21 = vector.load %arg2[%c0, %c0_11] : memref<16x16xf32, #tpu.memory_space<vmem>>, vector<16x16xf32>
      %c0_12 = arith.constant 0 : index
      %c0_13 = arith.constant 0 : index
      %22 = vector.load %arg3[%c0_12, %c0_13] : memref<16x16xf32, #tpu.memory_space<vmem>>, vector<16x16xf32>
      %c0_14 = arith.constant 0 : index
      %c0_15 = arith.constant 0 : index
      %23 = vector.load %arg4[%c0_14, %c0_15] : memref<16x16xi32, #tpu.memory_space<vmem>>, vector<16x16xi32>
      %cst = arith.constant dense<0> : vector<16x16xi32>
      %24 = arith.cmpi ne, %23, %cst : vector<16x16xi32>
      %cst_16 = arith.constant 0.000000e+00 : f32
      %25 = vector.broadcast %cst_16 : f32 to vector<16x16xf32>
      %26 = arith.select %24, %21, %25 : vector<16x16xi1>, vector<16x16xf32>
      %cst_17 = arith.constant 0.000000e+00 : f32
      %27 = vector.broadcast %cst_17 : f32 to vector<16x16xf32>
      %28 = arith.select %24, %22, %27 : vector<16x16xi1>, vector<16x16xf32>
      %cst_18 = arith.constant 1.000000e+00 : f32
      %cst_19 = arith.constant 0.000000e+00 : f32
      %29 = vector.broadcast %cst_18 : f32 to vector<16x16xf32>
      %30 = vector.broadcast %cst_19 : f32 to vector<16x16xf32>
      %31 = arith.select %24, %29, %30 : vector<16x16xi1>, vector<16x16xf32>
      %c0_20 = arith.constant 0 : index
      %c0_21 = arith.constant 0 : index
      %c0_22 = arith.constant 0 : index
      %32 = vector.load %arg6[%c0_20, %c0_21, %c0_22] : memref<6x1x16xf32, #tpu.memory_space<vmem>>, vector<1x1x16xf32>
      %33 = vector.shape_cast %32 : vector<1x1x16xf32> to vector<1x16xf32>
      %34 = arith.mulf %26, %26 : vector<16x16xf32>
      %35 = vector.shape_cast %34 : vector<16x16xf32> to vector<2x8x16xf32>
      %cst_23 = arith.constant dense<0.000000e+00> : vector<8x16xf32>
      %36 = vector.multi_reduction <add>, %35, %cst_23 [0] : vector<2x8x16xf32> to vector<8x16xf32>
      %cst_24 = arith.constant dense<0.000000e+00> : vector<16xf32>
      %37 = vector.multi_reduction <add>, %36, %cst_24 [0] : vector<8x16xf32> to vector<16xf32>
      %38 = vector.shape_cast %37 : vector<16xf32> to vector<1x16xf32>
      %39 = arith.addf %33, %38 : vector<1x16xf32>
      %c0_25 = arith.constant 0 : index
      %c0_26 = arith.constant 0 : index
      %c0_27 = arith.constant 0 : index
      %40 = vector.load %arg6[%c0_25, %c0_26, %c0_27] : memref<6x1x16xf32, #tpu.memory_space<vmem>>, vector<1x1x16xf32>
      %41 = vector.shape_cast %40 : vector<1x1x16xf32> to vector<1x16xf32>
      %42 = vector.shape_cast %39 : vector<1x16xf32> to vector<1x1x16xf32>
      tpu.vector_store %arg6[%c0_25, %c0_26, %c0_27], %42 {strides = array<i32>} : memref<6x1x16xf32, #tpu.memory_space<vmem>>, vector<1x1x16xf32>,
      %c1 = arith.constant 1 : index
      %c0_28 = arith.constant 0 : index
      %c0_29 = arith.constant 0 : index
      %43 = vector.load %arg6[%c1, %c0_28, %c0_29] : memref<6x1x16xf32, #tpu.memory_space<vmem>>, vector<1x1x16xf32>
      %44 = vector.shape_cast %43 : vector<1x1x16xf32> to vector<1x16xf32>
      %45 = vector.shape_cast %26 : vector<16x16xf32> to vector<2x8x16xf32>
      %cst_30 = arith.constant dense<0.000000e+00> : vector<8x16xf32>
      %46 = vector.multi_reduction <add>, %45, %cst_30 [0] : vector<2x8x16xf32> to vector<8x16xf32>
      %cst_31 = arith.constant dense<0.000000e+00> : vector<16xf32>
      %47 = vector.multi_reduction <add>, %46, %cst_31 [0] : vector<8x16xf32> to vector<16xf32>
      %48 = vector.shape_cast %47 : vector<16xf32> to vector<1x16xf32>
      %49 = arith.addf %44, %48 : vector<1x16xf32>
      %c1_32 = arith.constant 1 : index
      %c0_33 = arith.constant 0 : index
      %c0_34 = arith.constant 0 : index
      %50 = vector.load %arg6[%c1_32, %c0_33, %c0_34] : memref<6x1x16xf32, #tpu.memory_space<vmem>>, vector<1x1x16xf32>
      %51 = vector.shape_cast %50 : vector<1x1x16xf32> to vector<1x16xf32>
      %52 = vector.shape_cast %49 : vector<1x16xf32> to vector<1x1x16xf32>
      tpu.vector_store %arg6[%c1_32, %c0_33, %c0_34], %52 {strides = array<i32>} : memref<6x1x16xf32, #tpu.memory_space<vmem>>, vector<1x1x16xf32>,
      %c2 = arith.constant 2 : index
      %c0_35 = arith.constant 0 : index
      %c0_36 = arith.constant 0 : index
      %53 = vector.load %arg6[%c2, %c0_35, %c0_36] : memref<6x1x16xf32, #tpu.memory_space<vmem>>, vector<1x1x16xf32>
      %54 = vector.shape_cast %53 : vector<1x1x16xf32> to vector<1x16xf32>
      %55 = vector.shape_cast %31 : vector<16x16xf32> to vector<2x8x16xf32>
      %cst_37 = arith.constant dense<0.000000e+00> : vector<8x16xf32>
      %56 = vector.multi_reduction <add>, %55, %cst_37 [0] : vector<2x8x16xf32> to vector<8x16xf32>
      %cst_38 = arith.constant dense<0.000000e+00> : vector<16xf32>
      %57 = vector.multi_reduction <add>, %56, %cst_38 [0] : vector<8x16xf32> to vector<16xf32>
      %58 = vector.shape_cast %57 : vector<16xf32> to vector<1x16xf32>
      %59 = arith.addf %54, %58 : vector<1x16xf32>
      %c2_39 = arith.constant 2 : index
      %c0_40 = arith.constant 0 : index
      %c0_41 = arith.constant 0 : index
      %60 = vector.load %arg6[%c2_39, %c0_40, %c0_41] : memref<6x1x16xf32, #tpu.memory_space<vmem>>, vector<1x1x16xf32>
      %61 = vector.shape_cast %60 : vector<1x1x16xf32> to vector<1x16xf32>
      %62 = vector.shape_cast %59 : vector<1x16xf32> to vector<1x1x16xf32>
      tpu.vector_store %arg6[%c2_39, %c0_40, %c0_41], %62 {strides = array<i32>} : memref<6x1x16xf32, #tpu.memory_space<vmem>>, vector<1x1x16xf32>,
      %c3 = arith.constant 3 : index
      %c0_42 = arith.constant 0 : index
      %c0_43 = arith.constant 0 : index
      %63 = vector.load %arg6[%c3, %c0_42, %c0_43] : memref<6x1x16xf32, #tpu.memory_space<vmem>>, vector<1x1x16xf32>
      %64 = vector.shape_cast %63 : vector<1x1x16xf32> to vector<1x16xf32>
      %65 = arith.mulf %26, %28 : vector<16x16xf32>
      %66 = vector.shape_cast %65 : vector<16x16xf32> to vector<2x8x16xf32>
      %cst_44 = arith.constant dense<0.000000e+00> : vector<8x16xf32>
      %67 = vector.multi_reduction <add>, %66, %cst_44 [0] : vector<2x8x16xf32> to vector<8x16xf32>
      %cst_45 = arith.constant dense<0.000000e+00> : vector<16xf32>
      %68 = vector.multi_reduction <add>, %67, %cst_45 [0] : vector<8x16xf32> to vector<16xf32>
      %69 = vector.shape_cast %68 : vector<16xf32> to vector<1x16xf32>
      %70 = arith.addf %64, %69 : vector<1x16xf32>
      %c3_46 = arith.constant 3 : index
      %c0_47 = arith.constant 0 : index
      %c0_48 = arith.constant 0 : index
      %71 = vector.load %arg6[%c3_46, %c0_47, %c0_48] : memref<6x1x16xf32, #tpu.memory_space<vmem>>, vector<1x1x16xf32>
      %72 = vector.shape_cast %71 : vector<1x1x16xf32> to vector<1x16xf32>
      %73 = vector.shape_cast %70 : vector<1x16xf32> to vector<1x1x16xf32>
      tpu.vector_store %arg6[%c3_46, %c0_47, %c0_48], %73 {strides = array<i32>} : memref<6x1x16xf32, #tpu.memory_space<vmem>>, vector<1x1x16xf32>,
      %c4 = arith.constant 4 : index
      %c0_49 = arith.constant 0 : index
      %c0_50 = arith.constant 0 : index
      %74 = vector.load %arg6[%c4, %c0_49, %c0_50] : memref<6x1x16xf32, #tpu.memory_space<vmem>>, vector<1x1x16xf32>
      %75 = vector.shape_cast %74 : vector<1x1x16xf32> to vector<1x16xf32>
      %76 = vector.shape_cast %28 : vector<16x16xf32> to vector<2x8x16xf32>
      %cst_51 = arith.constant dense<0.000000e+00> : vector<8x16xf32>
      %77 = vector.multi_reduction <add>, %76, %cst_51 [0] : vector<2x8x16xf32> to vector<8x16xf32>
      %cst_52 = arith.constant dense<0.000000e+00> : vector<16xf32>
      %78 = vector.multi_reduction <add>, %77, %cst_52 [0] : vector<8x16xf32> to vector<16xf32>
      %79 = vector.shape_cast %78 : vector<16xf32> to vector<1x16xf32>
      %80 = arith.addf %75, %79 : vector<1x16xf32>
      %c4_53 = arith.constant 4 : index
      %c0_54 = arith.constant 0 : index
      %c0_55 = arith.constant 0 : index
      %81 = vector.load %arg6[%c4_53, %c0_54, %c0_55] : memref<6x1x16xf32, #tpu.memory_space<vmem>>, vector<1x1x16xf32>
      %82 = vector.shape_cast %81 : vector<1x1x16xf32> to vector<1x16xf32>
      %83 = vector.shape_cast %80 : vector<1x16xf32> to vector<1x1x16xf32>
      tpu.vector_store %arg6[%c4_53, %c0_54, %c0_55], %83 {strides = array<i32>} : memref<6x1x16xf32, #tpu.memory_space<vmem>>, vector<1x1x16xf32>,
      %c0_56 = arith.constant 0 : index
      %c0_57 = arith.constant 0 : index
      %84 = vector.load %arg2[%c0_56, %c0_57] : memref<16x16xf32, #tpu.memory_space<vmem>>, vector<16x16xf32>
      %85 = arith.index_cast %arg1 : i32 to index
      %c0_58 = arith.constant 0 : index
      %c0_59 = arith.constant 0 : index
      %86 = vector.load %arg8[%85, %c0_58, %c0_59] : memref<1x16x16xf32, #tpu.memory_space<vmem>>, vector<1x16x16xf32>
      %87 = vector.shape_cast %86 : vector<1x16x16xf32> to vector<16x16xf32>
      %88 = vector.shape_cast %84 : vector<16x16xf32> to vector<1x16x16xf32>
      tpu.vector_store %arg8[%85, %c0_58, %c0_59], %88 {strides = array<i32>} : memref<1x16x16xf32, #tpu.memory_space<vmem>>, vector<1x16x16xf32>,
      %c0_60 = arith.constant 0 : index
      %c0_61 = arith.constant 0 : index
      %89 = vector.load %arg3[%c0_60, %c0_61] : memref<16x16xf32, #tpu.memory_space<vmem>>, vector<16x16xf32>
      %90 = arith.index_cast %arg1 : i32 to index
      %c0_62 = arith.constant 0 : index
      %c0_63 = arith.constant 0 : index
      %91 = vector.load %arg9[%90, %c0_62, %c0_63] : memref<1x16x16xf32, #tpu.memory_space<vmem>>, vector<1x16x16xf32>
      %92 = vector.shape_cast %91 : vector<1x16x16xf32> to vector<16x16xf32>
      %93 = vector.shape_cast %89 : vector<16x16xf32> to vector<1x16x16xf32>
      tpu.vector_store %arg9[%90, %c0_62, %c0_63], %93 {strides = array<i32>} : memref<1x16x16xf32, #tpu.memory_space<vmem>>, vector<1x16x16xf32>,
      %94 = arith.extui %24 : vector<16x16xi1> to vector<16x16xi8>
      %95 = arith.index_cast %arg1 : i32 to index
      %c0_64 = arith.constant 0 : index
      %c0_65 = arith.constant 0 : index
      %96 = vector.load %arg10[%95, %c0_64, %c0_65] : memref<1x16x16xi8, #tpu.memory_space<vmem>>, vector<1x16x16xi8>
      %97 = vector.shape_cast %96 : vector<1x16x16xi8> to vector<16x16xi8>
      %98 = vector.shape_cast %94 : vector<16x16xi8> to vector<1x16x16xi8>
      tpu.vector_store %arg10[%95, %c0_64, %c0_65], %98 {strides = array<i32>} : memref<1x16x16xi8, #tpu.memory_space<vmem>>, vector<1x16x16xi8>,
    } else {
    }
    %c0_i32_4 = arith.constant 0 : i32
    %8 = arith.cmpi eq, %arg0, %c0_i32_4 : i32
    %c0_i32_5 = arith.constant 0 : i32
    %9 = arith.cmpi eq, %arg1, %c0_i32_5 : i32
    %10 = arith.andi %8, %9 : i1
    %11 = arith.extui %10 : i1 to i32
    %c0_i32_6 = arith.constant 0 : i32
    %12 = arith.cmpi ne, %11, %c0_i32_6 : i32
    scf.if %12 {
      %c0 = arith.constant 0 : index
      %c0_11 = arith.constant 0 : index
      %c0_12 = arith.constant 0 : index
      %21 = vector.load %arg6[%c0, %c0_11, %c0_12] : memref<6x1x16xf32, #tpu.memory_space<vmem>>, vector<1x1x16xf32>
      %22 = vector.shape_cast %21 : vector<1x1x16xf32> to vector<1x16xf32>
      %23 = vector.shape_cast %22 : vector<1x16xf32> to vector<1x1x16xf32>
      %cst = arith.constant dense<0.000000e+00> : vector<1xf32>
      %24 = vector.multi_reduction <add>, %23, %cst [1, 2] : vector<1x1x16xf32> to vector<1xf32>
      %25 = vector.shape_cast %24 : vector<1xf32> to vector<1x1x1xf32>
      %26 = vector.extract %25[0, 0, 0] : f32 from vector<1x1x1xf32>
      %c1 = arith.constant 1 : index
      %c0_13 = arith.constant 0 : index
      %c0_14 = arith.constant 0 : index
      %27 = vector.load %arg6[%c1, %c0_13, %c0_14] : memref<6x1x16xf32, #tpu.memory_space<vmem>>, vector<1x1x16xf32>
      %28 = vector.shape_cast %27 : vector<1x1x16xf32> to vector<1x16xf32>
      %29 = vector.shape_cast %28 : vector<1x16xf32> to vector<1x1x16xf32>
      %cst_15 = arith.constant dense<0.000000e+00> : vector<1xf32>
      %30 = vector.multi_reduction <add>, %29, %cst_15 [1, 2] : vector<1x1x16xf32> to vector<1xf32>
      %31 = vector.shape_cast %30 : vector<1xf32> to vector<1x1x1xf32>
      %32 = vector.extract %31[0, 0, 0] : f32 from vector<1x1x1xf32>
      %c2 = arith.constant 2 : index
      %c0_16 = arith.constant 0 : index
      %c0_17 = arith.constant 0 : index
      %33 = vector.load %arg6[%c2, %c0_16, %c0_17] : memref<6x1x16xf32, #tpu.memory_space<vmem>>, vector<1x1x16xf32>
      %34 = vector.shape_cast %33 : vector<1x1x16xf32> to vector<1x16xf32>
      %35 = vector.shape_cast %34 : vector<1x16xf32> to vector<1x1x16xf32>
      %cst_18 = arith.constant dense<0.000000e+00> : vector<1xf32>
      %36 = vector.multi_reduction <add>, %35, %cst_18 [1, 2] : vector<1x1x16xf32> to vector<1xf32>
      %37 = vector.shape_cast %36 : vector<1xf32> to vector<1x1x1xf32>
      %38 = vector.extract %37[0, 0, 0] : f32 from vector<1x1x1xf32>
      %c3 = arith.constant 3 : index
      %c0_19 = arith.constant 0 : index
      %c0_20 = arith.constant 0 : index
      %39 = vector.load %arg6[%c3, %c0_19, %c0_20] : memref<6x1x16xf32, #tpu.memory_space<vmem>>, vector<1x1x16xf32>
      %40 = vector.shape_cast %39 : vector<1x1x16xf32> to vector<1x16xf32>
      %41 = vector.shape_cast %40 : vector<1x16xf32> to vector<1x1x16xf32>
      %cst_21 = arith.constant dense<0.000000e+00> : vector<1xf32>
      %42 = vector.multi_reduction <add>, %41, %cst_21 [1, 2] : vector<1x1x16xf32> to vector<1xf32>
      %43 = vector.shape_cast %42 : vector<1xf32> to vector<1x1x1xf32>
      %44 = vector.extract %43[0, 0, 0] : f32 from vector<1x1x1xf32>
      %c4 = arith.constant 4 : index
      %c0_22 = arith.constant 0 : index
      %c0_23 = arith.constant 0 : index
      %45 = vector.load %arg6[%c4, %c0_22, %c0_23] : memref<6x1x16xf32, #tpu.memory_space<vmem>>, vector<1x1x16xf32>
      %46 = vector.shape_cast %45 : vector<1x1x16xf32> to vector<1x16xf32>
      %47 = vector.shape_cast %46 : vector<1x16xf32> to vector<1x1x16xf32>
      %cst_24 = arith.constant dense<0.000000e+00> : vector<1xf32>
      %48 = vector.multi_reduction <add>, %47, %cst_24 [1, 2] : vector<1x1x16xf32> to vector<1xf32>
      %49 = vector.shape_cast %48 : vector<1xf32> to vector<1x1x1xf32>
      %50 = vector.extract %49[0, 0, 0] : f32 from vector<1x1x1xf32>
      %cst_25 = arith.constant 0.000000e+00 : f32
      %51 = arith.cmpf ogt, %38, %cst_25 : f32
      %cst_26 = arith.constant 1.000000e+00 : f32
      %cst_27 = arith.constant 0.000000e+00 : f32
      %52 = arith.select %51, %cst_26, %cst_27 : f32
      %cst_28 = arith.constant 1.000000e+00 : f32
      %53 = arith.select %51, %38, %cst_28 : f32
      %54 = arith.divf %52, %53 : f32
      %55 = arith.mulf %32, %32 : f32
      %56 = arith.mulf %55, %54 : f32
      %57 = arith.subf %26, %56 : f32
      %58 = arith.mulf %32, %50 : f32
      %59 = arith.mulf %58, %54 : f32
      %60 = arith.subf %44, %59 : f32
      %cst_29 = arith.constant 0.000000e+00 : f32
      %61 = arith.cmpf ogt, %57, %cst_29 : f32
      %62 = arith.andi %51, %61 : i1
      %cst_30 = arith.constant 0.000000e+00 : f32
      %63 = arith.select %62, %60, %cst_30 : f32
      %cst_31 = arith.constant 1.000000e+00 : f32
      %64 = arith.select %62, %57, %cst_31 : f32
      %65 = arith.divf %63, %64 : f32
      %66 = arith.mulf %65, %32 : f32
      %67 = arith.subf %50, %66 : f32
      %68 = arith.mulf %67, %54 : f32
      %cst_32 = arith.constant 0.000000e+00 : f32
      %69 = arith.select %62, %68, %cst_32 : f32
      %c0_33 = arith.constant 0 : index
      %70 = memref.load %arg7[%c0_33] : memref<2xf32, #tpu.memory_space<smem>>
      memref.store %65, %arg7[%c0_33] : memref<2xf32, #tpu.memory_space<smem>>
      %c1_34 = arith.constant 1 : index
      %71 = memref.load %arg7[%c1_34] : memref<2xf32, #tpu.memory_space<smem>>
      memref.store %69, %arg7[%c1_34] : memref<2xf32, #tpu.memory_space<smem>>
    } else {
    }
    %c1_i32 = arith.constant 1 : i32
    %13 = arith.cmpi eq, %arg0, %c1_i32 : i32
    %14 = arith.extui %13 : i1 to i32
    %c0_i32_7 = arith.constant 0 : i32
    %15 = arith.cmpi ne, %14, %c0_i32_7 : i32
    scf.if %15 {
      %21 = arith.index_cast %arg1 : i32 to index
      %c0 = arith.constant 0 : index
      %c0_11 = arith.constant 0 : index
      %22 = vector.load %arg8[%21, %c0, %c0_11] : memref<1x16x16xf32, #tpu.memory_space<vmem>>, vector<1x16x16xf32>
      %23 = vector.shape_cast %22 : vector<1x16x16xf32> to vector<16x16xf32>
      %24 = arith.index_cast %arg1 : i32 to index
      %c0_12 = arith.constant 0 : index
      %c0_13 = arith.constant 0 : index
      %25 = vector.load %arg9[%24, %c0_12, %c0_13] : memref<1x16x16xf32, #tpu.memory_space<vmem>>, vector<1x16x16xf32>
      %26 = vector.shape_cast %25 : vector<1x16x16xf32> to vector<16x16xf32>
      %27 = arith.index_cast %arg1 : i32 to index
      %c0_14 = arith.constant 0 : index
      %c0_15 = arith.constant 0 : index
      %28 = vector.load %arg10[%27, %c0_14, %c0_15] : memref<1x16x16xi8, #tpu.memory_space<vmem>>, vector<1x16x16xi8>
      %29 = vector.shape_cast %28 : vector<1x16x16xi8> to vector<16x16xi8>
      %c0_i8 = arith.constant 0 : i8
      %30 = vector.broadcast %c0_i8 : i8 to vector<16x16xi8>
      %31 = arith.cmpi ne, %29, %30 : vector<16x16xi8>
      %c0_16 = arith.constant 0 : index
      %32 = memref.load %arg7[%c0_16] : memref<2xf32, #tpu.memory_space<smem>>
      %33 = vector.broadcast %32 : f32 to vector<16x16xf32>
      %34 = arith.mulf %33, %23 : vector<16x16xf32>
      %c1 = arith.constant 1 : index
      %35 = memref.load %arg7[%c1] : memref<2xf32, #tpu.memory_space<smem>>
      %36 = vector.broadcast %35 : f32 to vector<16x16xf32>
      %37 = arith.addf %34, %36 : vector<16x16xf32>
      %38 = arith.subf %37, %26 : vector<16x16xf32>
      %c5 = arith.constant 5 : index
      %c0_17 = arith.constant 0 : index
      %c0_18 = arith.constant 0 : index
      %39 = vector.load %arg6[%c5, %c0_17, %c0_18] : memref<6x1x16xf32, #tpu.memory_space<vmem>>, vector<1x1x16xf32>
      %40 = vector.shape_cast %39 : vector<1x1x16xf32> to vector<1x16xf32>
      %41 = math.absf %38 : vector<16x16xf32>
      %cst = arith.constant 0.000000e+00 : f32
      %42 = vector.broadcast %cst : f32 to vector<16x16xf32>
      %43 = arith.select %31, %41, %42 : vector<16x16xi1>, vector<16x16xf32>
      %44 = vector.shape_cast %43 : vector<16x16xf32> to vector<2x8x16xf32>
      %cst_19 = arith.constant dense<0.000000e+00> : vector<8x16xf32>
      %45 = vector.multi_reduction <add>, %44, %cst_19 [0] : vector<2x8x16xf32> to vector<8x16xf32>
      %cst_20 = arith.constant dense<0.000000e+00> : vector<16xf32>
      %46 = vector.multi_reduction <add>, %45, %cst_20 [0] : vector<8x16xf32> to vector<16xf32>
      %47 = vector.shape_cast %46 : vector<16xf32> to vector<1x16xf32>
      %48 = arith.addf %40, %47 : vector<1x16xf32>
      %c5_21 = arith.constant 5 : index
      %c0_22 = arith.constant 0 : index
      %c0_23 = arith.constant 0 : index
      %49 = vector.load %arg6[%c5_21, %c0_22, %c0_23] : memref<6x1x16xf32, #tpu.memory_space<vmem>>, vector<1x1x16xf32>
      %50 = vector.shape_cast %49 : vector<1x1x16xf32> to vector<1x16xf32>
      %51 = vector.shape_cast %48 : vector<1x16xf32> to vector<1x1x16xf32>
      tpu.vector_store %arg6[%c5_21, %c0_22, %c0_23], %51 {strides = array<i32>} : memref<6x1x16xf32, #tpu.memory_space<vmem>>, vector<1x1x16xf32>,
    } else {
    }
    %c1_i32_8 = arith.constant 1 : i32
    %16 = arith.cmpi eq, %arg0, %c1_i32_8 : i32
    %c0_i32_9 = arith.constant 0 : i32
    %17 = arith.cmpi eq, %arg1, %c0_i32_9 : i32
    %18 = arith.andi %16, %17 : i1
    %19 = arith.extui %18 : i1 to i32
    %c0_i32_10 = arith.constant 0 : i32
    %20 = arith.cmpi ne, %19, %c0_i32_10 : i32
    scf.if %20 {
      %c2 = arith.constant 2 : index
      %c0 = arith.constant 0 : index
      %c0_11 = arith.constant 0 : index
      %21 = vector.load %arg6[%c2, %c0, %c0_11] : memref<6x1x16xf32, #tpu.memory_space<vmem>>, vector<1x1x16xf32>
      %22 = vector.shape_cast %21 : vector<1x1x16xf32> to vector<1x16xf32>
      %23 = vector.shape_cast %22 : vector<1x16xf32> to vector<1x1x16xf32>
      %cst = arith.constant dense<0.000000e+00> : vector<1xf32>
      %24 = vector.multi_reduction <add>, %23, %cst [1, 2] : vector<1x1x16xf32> to vector<1xf32>
      %25 = vector.shape_cast %24 : vector<1xf32> to vector<1x1x1xf32>
      %26 = vector.extract %25[0, 0, 0] : f32 from vector<1x1x1xf32>
      %c5 = arith.constant 5 : index
      %c0_12 = arith.constant 0 : index
      %c0_13 = arith.constant 0 : index
      %27 = vector.load %arg6[%c5, %c0_12, %c0_13] : memref<6x1x16xf32, #tpu.memory_space<vmem>>, vector<1x1x16xf32>
      %28 = vector.shape_cast %27 : vector<1x1x16xf32> to vector<1x16xf32>
      %29 = vector.shape_cast %28 : vector<1x16xf32> to vector<1x1x16xf32>
      %cst_14 = arith.constant dense<0.000000e+00> : vector<1xf32>
      %30 = vector.multi_reduction <add>, %29, %cst_14 [1, 2] : vector<1x1x16xf32> to vector<1xf32>
      %31 = vector.shape_cast %30 : vector<1xf32> to vector<1x1x1xf32>
      %32 = vector.extract %31[0, 0, 0] : f32 from vector<1x1x1xf32>
      %33 = arith.divf %32, %26 : f32
      %c0_15 = arith.constant 0 : index
      %c0_16 = arith.constant 0 : index
      %34 = memref.load %arg5[%c0_15, %c0_16] : memref<1x1xf32, #tpu.memory_space<smem>>
      memref.store %33, %arg5[%c0_15, %c0_16] : memref<1x1xf32, #tpu.memory_space<smem>>
    } else {
    }
    return
  }
  func.func @transform_0(%arg0: i32, %arg1: i32) -> (i32, i32) {
    %c1_i32 = arith.constant 1 : i32
    %0 = arith.subi %c1_i32, %arg0 : i32
    %1 = arith.muli %arg1, %0 : i32
    %c0_i32 = arith.constant 0 : i32
    %2 = arith.muli %c0_i32, %arg0 : i32
    %3 = arith.addi %1, %2 : i32
    %c0_i32_0 = arith.constant 0 : i32
    %c0_i32_1 = arith.constant 0 : i32
    return %3, %c0_i32_0 : i32, i32
  }
  func.func @transform_1(%arg0: i32, %arg1: i32) -> (i32, i32) {
    %c1_i32 = arith.constant 1 : i32
    %0 = arith.subi %c1_i32, %arg0 : i32
    %1 = arith.muli %arg1, %0 : i32
    %c0_i32 = arith.constant 0 : i32
    %2 = arith.muli %c0_i32, %arg0 : i32
    %3 = arith.addi %1, %2 : i32
    %c0_i32_0 = arith.constant 0 : i32
    %c0_i32_1 = arith.constant 0 : i32
    return %3, %c0_i32_0 : i32, i32
  }
  func.func @transform_2(%arg0: i32, %arg1: i32) -> (i32, i32) {
    %c1_i32 = arith.constant 1 : i32
    %0 = arith.subi %c1_i32, %arg0 : i32
    %1 = arith.muli %arg1, %0 : i32
    %c0_i32 = arith.constant 0 : i32
    %2 = arith.muli %c0_i32, %arg0 : i32
    %3 = arith.addi %1, %2 : i32
    %c0_i32_0 = arith.constant 0 : i32
    %c0_i32_1 = arith.constant 0 : i32
    return %3, %c0_i32_0 : i32, i32
  }
  func.func @transform_3(%arg0: i32, %arg1: i32) -> (i32, i32) {
    %c0_i32 = arith.constant 0 : i32
    %c0_i32_0 = arith.constant 0 : i32
    %c0_i32_1 = arith.constant 0 : i32
    return %c0_i32, %c0_i32_0 : i32, i32
  }
}

</mosaic_0001>

<bundles_post_ra>
// kernel: tpu_custom_call.1
= control target key start
LH: loop header
LB: loop body
LE: loop exit
PB: predicated region body
PF: predicated region fallthrough
CT: control target
= control target key end

     0   :  { %8 = vsyncpa [#allocation8], 0  ;;  %s1034_s0 = inlined_call_operand.vmem [shape: f32[16,16], index: 0, kind: input, shape index: {}]   ;;  %s1035_s1 = inlined_call_operand.hbm [shape: f32[16,16], index: 1, kind: input, shape index: {}]   ;;  %s1036_s2 = inlined_call_operand.vmem [shape: s32[16,16], index: 2, kind: input, shape index: {}]   ;;  %s1037_s3 = inlined_call_operand.hbm [shape: f32[1,1], index: 3, kind: output, shape index: {}]  }
   0x1   :  { %10 = vsyncpa [#allocation8 + $0x1], 0 }
   0x2   :  { %11 = vsyncpa [#allocation9], 0  ;;  %s882_s12 = smov 0   ;;  %s884_s13 = smov 0  }
   0x3   :  { %s886_s14 = smov 0  }
   0x4 LB: > { %s685_s15 = sadd.s32 4294967295, %s852_s14   ;;  %s29_s16 = sadd.s32 1, %s848_s13  ;;  %s852_s14 = sphi %s886_s14, %s17_s14   ;;  %s848_s13 = sphi %s884_s13, %s1045_s13   ;;  %s844_s12 = sphi %s882_s12, %s1044_s12  }
   0x5   : > { %p31_p0 = scmp.ge.s32.totalorder %s29_s16, 2  ;;  %p739_p1 = scmp.lt.s32.totalorder %s852_s14, 2 }
   0x6   : > { %p740_p2 = scmp.eq.s32.totalorder %s852_s14, 0  ;;  %s854_s17 = smov [#allocation7]  }
   0x7   : > { %s1047_s16 = smov (%p31_p0, %s29_s16), 0  ;;  %s184_s18 = sshll.u32 %s854_s17, 4  ;;  %s185_s18 = int_to_ptr.vmem [resolvable:$true] %s184_s18 }
   0x8   : > { %p903_p3 = pnand %p740_p2, %p739_p1  ;;  %s782_s22 = scalar_lea.hbm %s1035_s1, 256 }
   0x9   : > { %p783_p6 = scmp.ne.s32.totalorder %s1035_s1, %s782_s22  ;;  %p789_p10 = scmp.lt.u32.totalorder %s782_s22, %s1035_s1 }
   0xa   : > { %p784_p7 = pneg %p903_p3 }
   0xc   : > { %p785_p8 = pnand %p784_p7, %p783_p6 }
   0xe   : > { %p786_p9 = pneg %p785_p8 }
  0x10   : > { %p791_p11 = pnand %p789_p10, %p786_p9 }
  0x12   : > { %794 = shalt.err (!%p791_p11)
}
  0x13   : > { %s795_s27 = scalar_lea.vmem %s185_s18, 256  ;;  %s802_s28 = scalar_lea.vmem %s185_s18, 512 }
  0x14   : > { %p796_p12 = scmp.ne.s32.totalorder %s185_s18, %s795_s27  ;;  %p803_p1 = scmp.lt.s32.totalorder %s185_s18, %s185_s18 }
  0x15   : > { %p804_p2 = scmp.lt.s32.totalorder %s802_s28, %s795_s27 }
  0x16   : > { %p798_p13 = pnand %p796_p12, %p784_p7 }
  0x17   : > { %p805_p4 = por %p804_p2, %p803_p1 }
  0x18   : > { %p799_p0 = pneg %p798_p13 }
  0x1a   : > { %p806_p5 = pnand %p805_p4, %p799_p0 }
  0x1c   : > { %809 = shalt.err (!%p806_p5)
}
  0x1d   : > { %s855_s29 = smov 128   ;;  %s856_s30 = smov 8  }
  0x1e   : > { %738 = dma.hbm_to_vmem [thread:$0]  (!%p903_p3), %s1035_s1, 256, %s185_s18, [#allocation8], %s855_s29, %s855_s29, %s856_s30  }
  0x1f   : > { %p1039_p6 = scmp.lt.s32.totalorder %s852_s14, 3  ;;  %p1040_p8 = scmp.ge.s32.totalorder %s852_s14, 1 }
  0x21   : > { %p206_p7 = pnand %p1040_p8, %p1039_p6 }
  0x22   : > { %p741_p9 = scmp.eq.s32.totalorder (!%p206_p7), %s685_s15, 0 }
  0x23   : > { %209 = sbr.rel (%p206_p7) target bundleno = 766 (0x2fe), region = 32 }
  0x2a   : > { %835 = dma.done.wait (%p741_p9), [#allocation8], 256  }
  0x2b   : > { %837 = vsyncadd (%p741_p9), [#allocation8], 4294967040  ;;  %p272_p4 = scmp.eq.s32.totalorder %s844_s12, 0 }
  0x2c   : > { %vm278_vm0 = vcmask (%p272_p4), 122880   ;;  %v857_v0 = vmov (%p272_p4), 0.0  }
  0x2d   : > { %277 = sbr.rel (!%p272_p4) target bundleno = 52 (0x34), region = 40  ;;  %279 = vst.msk [vmem:[#allocation2] sm:$0x1] (%p272_p4), %vm278_vm0, %v857_v0  ;;  %280 = vst.msk [vmem:[#allocation2 + $0x1] sm:$0x1] (%p272_p4), %vm278_vm0, %v857_v0 }
  0x2e   : > { %281 = vst.msk [vmem:[#allocation2 + $0x2] sm:$0x1] (%p272_p4), %vm278_vm0, %v857_v0  ;;  %282 = vst.msk [vmem:[#allocation2 + $0x3] sm:$0x1] (%p272_p4), %vm278_vm0, %v857_v0 }
  0x2f   : > { %283 = vst.msk [vmem:[#allocation2 + $0x4] sm:$0x1] (%p272_p4), %vm278_vm0, %v857_v0  ;;  %284 = vst.msk [vmem:[#allocation2 + $0x5] sm:$0x1] (%p272_p4), %vm278_vm0, %v857_v0 }
  0x34 PF: > { %p694_p3 = scmp.ne.s32.totalorder %s844_s12, 0 }
  0x35   : > { %v288_v1 = vld [vmem:[%s1034_s0] sm:$0xff] (!%p694_p3)  ;;  %v289_v2 = vld [vmem:[%s1034_s0 + $0x8] sm:$0xff] (!%p694_p3)  ;;  %vm305_vm1 = vcmask (!%p694_p3), 130048   ;;  %v858_v6 = vmov (!%p694_p3), 0.0   ;;  %v291_v13 = vld [vmem:[#allocation7 + $0x8] sm:$0xff] (!%p694_p3)  ;;  %v859_v43 = vmov (!%p694_p3), 0  }
  0x36   : > { %287 = sbr.rel (%p694_p3) target bundleno = 82 (0x52), region = 44  ;;  %v292_v3 = vld [vmem:[%s1036_s2] sm:$0xff] (!%p694_p3)  ;;  %v293_v4 = vld [vmem:[%s1036_s2 + $0x8] sm:$0xff] (!%p694_p3)  ;;  %381 = vst.msk [vmem:[#allocation4] sm:$0xff] (!%p694_p3), %vm305_vm1, %v288_v1  ;;  %382 = vst.msk [vmem:[#allocation4 + $0x8] sm:$0xff] (!%p694_p3), %vm305_vm1, %v289_v2  ;;  %vm400_vm6 = vcmask (!%p694_p3), 123904  }
  0x37   : > { %vm294_vm2 = vcmp.ne.s32.totalorder (!%p694_p3), %v292_v3, 0  ;;  %vm295_vm3 = vcmp.ne.s32.totalorder (!%p694_p3), %v293_v4, 0  ;;  %v290_v8 = vld [vmem:[#allocation7] sm:$0xff] (!%p694_p3)  ;;  %387 = vst.msk [vmem:[#allocation5 + $0x8] sm:$0xff] (!%p694_p3), %vm305_vm1, %v291_v13  ;;  %v320_v63 = vld [vmem:[#allocation2 + $0x1] sm:$0x1] (!%p694_p3) }
  0x38   : > { %v296_v5 = vsel (!%p694_p3), %vm294_vm2, %v288_v1, 0.0  ;;  %v300_v7 = vsel (!%p694_p3), %vm294_vm2, 1.0, %v858_v6  ;;  %v297_v9 = vsel (!%p694_p3), %vm295_vm3, %v289_v2, 0.0  ;;  %v301_v12 = vsel (!%p694_p3), %vm295_vm3, 1.0, %v858_v6  ;;  %386 = vst.msk [vmem:[#allocation5] sm:$0xff] (!%p694_p3), %vm305_vm1, %v290_v8  ;;  %vm963_vm4 = vmpackc.low (!%p694_p3), %vm295_vm3, %vm294_vm2 }
  0x39   : > { %v303_v10 = vmul.f32 (!%p694_p3), %v296_v5, %v296_v5  ;;  %v321_v11 = vsel (!%p694_p3), %vm305_vm1, %v296_v5, 0.0  ;;  %v304_v14 = vmul.f32 (!%p694_p3), %v297_v9, %v297_v9  ;;  %v322_v15 = vsel (!%p694_p3), %vm305_vm1, %v297_v9, 0.0  ;;  %vm389_vm5 = vmpackc.even (!%p694_p3), %vm963_vm4, %vm963_vm4  ;;  %v334_v0 = vld [vmem:[#allocation2 + $0x2] sm:$0x1] (!%p694_p3) }
  0x3a   : > { %v335_v16 = vsel (!%p694_p3), %vm305_vm1, %v300_v7, 0.0  ;;  %v336_v17 = vsel (!%p694_p3), %vm305_vm1, %v301_v12, 0.0  ;;  %v323_v19 = vadd.f32 (!%p694_p3), %v322_v15, %v321_v11  ;;  %v298_v21 = vsel (!%p694_p3), %vm294_vm2, %v290_v8, 0.0  ;;  %v302_v8 = vld [vmem:[#allocation2] sm:$0x1] (!%p694_p3) }
  0x3b   : > { %v306_v18 = vsel (!%p694_p3), %vm305_vm1, %v303_v10, 0.0  ;;  %v337_v20 = vadd.f32 (!%p694_p3), %v336_v17, %v335_v16  ;;  %v307_v23 = vsel (!%p694_p3), %vm305_vm1, %v304_v14, 0.0  ;;  %v299_v24 = vsel (!%p694_p3), %vm295_vm3, %v291_v13, 0.0  ;;  %v348_v17 = vld [vmem:[#allocation2 + $0x3] sm:$0x1] (!%p694_p3) }
  0x3c   : > { %v349_v25 = vmul.f32 (!%p694_p3), %v298_v21, %v296_v5  ;;  %v365_v26 = vsel (!%p694_p3), %vm305_vm1, %v298_v21, 0.0  ;;  %v308_v27 = vadd.f32 (!%p694_p3), %v307_v23, %v306_v18  ;;  %v324_v28 = vsel (!%p694_p3), %vm305_vm1, %v323_v19, 0.0  ;;  %v364_v18 = vld [vmem:[#allocation2 + $0x4] sm:$0x1] (!%p694_p3) }
  0x3d   : > { %v338_v29 = vsel %vm305_vm1, %v337_v20, 0.0  ;;  %v350_v30 = vmul.f32 %v299_v24, %v297_v9  ;;  %v325_v31 = vrot.slane %v324_v28, 4  ;;  %v366_v34 = vsel %vm305_vm1, %v299_v24, 0.0 }
  0x3e   : > { %v339_v32 = vrot.slane %v338_v29, 4  ;;  %v351_v33 = vsel %vm305_vm1, %v349_v25, 0.0  ;;  %v309_v35 = vsel %vm305_vm1, %v308_v27, 0.0  ;;  %v367_v37 = vadd.f32 %v366_v34, %v365_v26 }
  0x3f   : > { %v352_v36 = vsel %vm305_vm1, %v350_v30, 0.0  ;;  %v310_v38 = vrot.slane %v309_v35, 4  ;;  %v326_v39 = vadd.f32 %v325_v31, %v324_v28  ;;  %v390_v44 = vsel %vm389_vm5, 16843009, %v859_v43 }
  0x40   : > { %v340_v40 = vadd.f32 %v339_v32, %v338_v29  ;;  %v353_v41 = vadd.f32 %v352_v36, %v351_v33  ;;  %v368_v42 = vsel %vm305_vm1, %v367_v37, 0.0  ;;  %v391_v51 = vunpack.c.0.s8 %v390_v44 }
  0x41   : > { %v311_v45 = vadd.f32 %v310_v38, %v309_v35  ;;  %v327_v46 = vrot.slane %v326_v39, 2  ;;  %v369_v50 = vrot.slane %v368_v42, 4  ;;  %v392_v52 = vunpack.c.1.s8 %v390_v44 }
  0x42   : > { %v341_v47 = vrot.slane %v340_v40, 2  ;;  %v354_v48 = vsel %vm305_vm1, %v353_v41, 0.0  ;;  %v393_v58 = vpack.c.b16 %v391_v51, %v391_v51  ;;  %vm317_vm7 = vcmask 122880  }
  0x43   : > { %v355_v49 = vrot.slane %v354_v48, 4  ;;  %v312_v53 = vrot.slane %v311_v45, 2  ;;  %v328_v54 = vadd.f32 %v327_v46, %v326_v39  ;;  %v370_v57 = vadd.f32 %v369_v50, %v368_v42 }
  0x44   : > { %v342_v55 = vadd.f32 %v341_v47, %v340_v40  ;;  %v395_v59 = vpack.c.b16 %v392_v52, %v392_v52  ;;  %v394_v3 = vpack.c.b8 %v393_v58, %v393_v58 }
  0x45   : > { %v356_v56 = vadd.f32 %v355_v49, %v354_v48  ;;  %v313_v60 = vadd.f32 %v312_v53, %v311_v45  ;;  %v329_v61 = vrot.slane %v328_v54, 1  ;;  %v371_v2 = vrot.slane %v370_v57, 2 }
  0x46   : > { %v343_v62 = vrot.slane %v342_v55, 1  ;;  %v396_v4 = vpack.c.b8 %v395_v59, %v395_v59  ;;  %401 = vst.msk [vmem:[#allocation6] sm:$0x3] %vm400_vm6, %v394_v3 }
  0x47   : > { %v357_v1 = vrot.slane %v356_v56, 2  ;;  %v314_v5 = vrot.slane %v313_v60, 1  ;;  %v330_v6 = vadd.f32 %v329_v61, %v328_v54  ;;  %v372_v10 = vadd.f32 %v371_v2, %v370_v57 }
  0x48   : > { %v344_v7 = vadd.f32 %v343_v62, %v342_v55  ;;  %402 = vst.msk [vmem:[#allocation6 + $0x2] sm:$0x3] %vm400_vm6, %v396_v4 }
  0x49   : > { %v358_v9 = vadd.f32 %v357_v1, %v356_v56  ;;  %v315_v11 = vadd.f32 %v314_v5, %v313_v60  ;;  %v331_v12 = vadd.f32 %v330_v6, %v320_v63  ;;  %v373_v15 = vrot.slane %v372_v10, 1 }
  0x4a   : > { %v345_v13 = vadd.f32 %v344_v7, %v334_v0 }
  0x4b   : > { %v359_v14 = vrot.slane %v358_v9, 1  ;;  %v316_v16 = vadd.f32 %v315_v11, %v302_v8  ;;  %332 = vst.msk [vmem:[#allocation2 + $0x1] sm:$0x1] %vm317_vm7, %v331_v12  ;;  %v374_v20 = vadd.f32 %v373_v15, %v372_v10 }
  0x4c   : > { %346 = vst.msk [vmem:[#allocation2 + $0x2] sm:$0x1] %vm317_vm7, %v345_v13 }
  0x4d   : > { %v360_v19 = vadd.f32 %v359_v14, %v358_v9  ;;  %318 = vst.msk [vmem:[#allocation2] sm:$0x1] %vm317_vm7, %v316_v16  ;;  %v375_v22 = vadd.f32 %v374_v20, %v364_v18 }
  0x4f   : > { %v361_v21 = vadd.f32 %v360_v19, %v348_v17  ;;  %376 = vst.msk [vmem:[#allocation2 + $0x4] sm:$0x1] %vm317_vm7, %v375_v22 }
  0x51   : > { %362 = vst.msk [vmem:[#allocation2 + $0x3] sm:$0x1] %vm317_vm7, %v361_v21 }
  0x52 PF: > { %404 = sbr.rel (!%p272_p4) target bundleno = 444 (0x1bc), region = 48  ;;  %vm406_vm8 = vcmask (%p272_p4), 122880   ;;  %v418_v27 = vld [vmem:[#allocation2 + $0x1] sm:$0x1] (%p272_p4) }
  0x53   : > { %v430_v23 = vld [vmem:[#allocation2 + $0x2] sm:$0x1] (%p272_p4)  ;;  %v419_v29 = vsel (%p272_p4), %vm406_vm8, %v418_v27, 0.0 }
  0x54   : > { %v405_v24 = vld [vmem:[#allocation2] sm:$0x1] (%p272_p4)  ;;  %v431_v25 = vsel (%p272_p4), %vm406_vm8, %v430_v23, 0.0 }
  0x55   : > { %v407_v26 = vsel (%p272_p4), %vm406_vm8, %v405_v24, 0.0  ;;  %432 = vadd.xlane.f32.xlu1 (%p272_p4), %v431_v25 }
  0x56   : > { %408 = vadd.xlane.f32.xlu0 (%p272_p4), %v407_v26  ;;  %v454_v31 = vld [vmem:[#allocation2 + $0x4] sm:$0x1] (%p272_p4) }
  0x57   : > { %v455_v32 = vsel (%p272_p4), %vm406_vm8, %v454_v31, 0.0 }
  0x58   : > { %v442_v28 = vld [vmem:[#allocation2 + $0x3] sm:$0x1] (%p272_p4) }
  0x59   : > { %v443_v30 = vsel %vm406_vm8, %v442_v28, 0.0 }
  0x5a   : > { %420 = vadd.xlane.f32.xlu0 %v419_v29  ;;  %444 = vadd.xlane.f32.xlu1 %v443_v30 }
  0x5e   : > { %456 = vadd.xlane.f32.xlu0 %v455_v32 }
  0xe2   : > { %v433_v33 = vpop.xlane.xlu1 %432 }
  0xe3   : > { %v409_v34 = vpop.xlane.xlu0 %408  ;;  %v434_v35 = vrot.slane %v433_v33, 4 }
  0xe4   : > { %v410_v36 = vrot.slane %v409_v34, 4 }
  0xe5   : > { %v435_v37 = vadd.f32 %v434_v35, %v433_v33 }
  0xe6   : > { %v411_v38 = vadd.f32 %v410_v36, %v409_v34 }
  0xe7   : > { %v421_v39 = vpop.xlane.xlu0 %420  ;;  %v445_v40 = vpop.xlane.xlu1 %444  ;;  %v436_v41 = vrot.slane %v435_v37, 2 }
  0xe8   : > { %v412_v42 = vrot.slane %v411_v38, 2  ;;  %v422_v43 = vrot.slane %v421_v39, 4  ;;  %v446_v44 = vrot.slane %v445_v40, 4 }
  0xe9   : > { %v437_v49 = vadd.f32 %v436_v41, %v435_v37 }
  0xea   : > { %v423_v45 = vadd.f32 %v422_v43, %v421_v39  ;;  %v447_v46 = vadd.f32 %v446_v44, %v445_v40  ;;  %v413_v47 = vadd.f32 %v412_v42, %v411_v38 }
  0xeb   : > { %v457_v48 = vpop.xlane.xlu0 %456  ;;  %v438_v58 = vrot.slane %v437_v49, 1 }
  0xec   : > { %v424_v50 = vrot.slane %v423_v45, 2  ;;  %v448_v51 = vrot.slane %v447_v46, 2  ;;  %v458_v52 = vrot.slane %v457_v48, 4  ;;  %v414_v53 = vrot.slane %v413_v47, 1 }
  0xed   : > { %v439_v1 = vadd.f32 %v438_v58, %v437_v49 }
  0xee   : > { %v449_v54 = vadd.f32 %v448_v51, %v447_v46  ;;  %v459_v55 = vadd.f32 %v458_v52, %v457_v48  ;;  %v415_v56 = vadd.f32 %v414_v53, %v413_v47  ;;  %v425_v57 = vadd.f32 %v424_v50, %v423_v45 }
  0xf0   : > { %v460_v59 = vrot.slane %v459_v55, 2  ;;  %707 = vpush %v415_v56  ;;  %v426_v60 = vrot.slane %v425_v57, 1  ;;  %v450_v61 = vrot.slane %v449_v54, 1 }
  0xf2   : > { %v461_v62 = vadd.f32 %v460_v59, %v459_v55  ;;  %v427_v63 = vadd.f32 %v426_v60, %v425_v57  ;;  %v451_v0 = vadd.f32 %v450_v61, %v449_v54 }
  0xf4   : > { %709 = vpush %v427_v63  ;;  %v462_v2 = vrot.slane %v461_v62, 1 }
  0xf5   : > { %711 = vpush %v439_v1 }
  0xf6   : > { %713 = vpush %v451_v0  ;;  %v463_v3 = vadd.f32 %v462_v2, %v461_v62 }
  0xf8   : > { %715 = vpush %v463_v3 }
 0x121   : > { %s708_s19 = spop %707 }
 0x125   : > { %s988_s20 = spop %709 }
 0x126   : > { %s712_s21 = spop %711  ;;  %s472_s26 = smul.f32 %s988_s20, %s988_s20 }
 0x127   : > { %p465_p5 = scmp.gt.f32.partialorder %s712_s21, 0.0  ;;  %s714_s23 = spop %713 }
 0x129   : > { %s467_s22 = scalar_select %p465_p5, %s712_s21, 1.0 }
 0x12a   : > { %s716_s24 = spop %715 }
 0x12b   : > { %v468_v4 = vstv %s467_s22  ;;  %s466_s25 = scalar_select %p465_p5, 1.0, 0.0 }
 0x12c   : > { %776 = vrcp.f32 %v468_v4  ;;  %s475_s5 = smul.f32 %s716_s24, %s988_s20 }
 0x136   : > { %v777_v5 = vpop.eup %776 }
 0x137   : > { %717 = vpush %v777_v5 }
 0x168   : > { %s718_s27 = spop %717 }
 0x169   : > { %s471_s28 = smul.f32 %s718_s27, %s466_s25 }
 0x16b   : > { %s473_s29 = smul.f32 %s472_s26, %s471_s28 }
 0x16c   : > { %s476_s6 = smul.f32 %s475_s5, %s471_s28 }
 0x16d   : > { %s474_s30 = ssub.f32 %s708_s19, %s473_s29 }
 0x16e   : > { %s477_s7 = ssub.f32 %s714_s23, %s476_s6 }
 0x16f   : > { %p478_p10 = scmp.gt.f32.partialorder %s474_s30, 0.0 }
 0x171   : > { %p995_p11 = pnand %p478_p10, %p465_p5 }
 0x173   : > { %s1049_s30 = smov (%p995_p11, %s474_s30), 1.0  ;;  %s1051_s7 = smov (%p995_p11, %s477_s7), 0.0 }
 0x174   : > { %v483_v6 = vstv %s1049_s30 }
 0x175   : > { %778 = vrcp.f32 %v483_v6 }
 0x17f   : > { %v779_v7 = vpop.eup %778 }
 0x180   : > { %719 = vpush %v779_v7 }
 0x1b1   : > { %s720_s8 = spop %719 }
 0x1b2   : > { %s486_s9 = smul.f32 %s720_s8, %s1051_s7 }
 0x1b4   : > { %s487_s10 = smul.f32 %s988_s20, %s486_s9  ;;  %492 = sst [smem:[#allocation3]] %s486_s9 }
 0x1b6   : > { %s488_s11 = ssub.f32 %s716_s24, %s487_s10 }
 0x1b8   : > { %s489_s17 = smul.f32 %s488_s11, %s471_s28 }
 0x1ba   : > { %s1053_s17 = smov (%p995_p11, %s489_s17), 0.0 }
 0x1bb   : > { %494 = sst [smem:[#allocation3 + $0x1]] %s1053_s17 }
 0x1bc PF: > { %p495_p12 = scmp.eq.s32.totalorder %s844_s12, 1  ;;  %p698_p13 = scmp.ne.s32.totalorder %s844_s12, 1 }
 0x1bd   : > { %s513_s18 = sld [smem:[#allocation3]] (!%p698_p13)  ;;  %v509_v8 = vld [vmem:[#allocation6] sm:$0x3] (!%p698_p13)  ;;  %v510_v9 = vld [vmem:[#allocation6 + $0x2] sm:$0x3] (!%p698_p13)  ;;  %s699_s19 = sld [smem:[#allocation3 + $0x1]] (!%p698_p13) }
 0x1be   : > { %498 = sbr.rel (%p698_p13) target bundleno = 480 (0x1e0), region = 52  ;;  %vm511_vm9 = vnez (!%p698_p13), %v509_v8  ;;  %vm512_vm10 = vnez (!%p698_p13), %v510_v9  ;;  %v501_v10 = vld [vmem:[#allocation4] sm:$0xff] (!%p698_p13)  ;;  %v502_v11 = vld [vmem:[#allocation4 + $0x8] sm:$0xff] (!%p698_p13)  ;;  %v860_v12 = vmov (!%p698_p13), 0   ;;  %v504_v18 = vld [vmem:[#allocation5] sm:$0xff] (!%p698_p13)  ;;  %vm535_vm13 = vcmask (!%p698_p13), 130048  }
 0x1bf   : > { %v527_v13 = vsel (!%p698_p13), %vm511_vm9, 16843009, %v860_v12  ;;  %v528_v14 = vsel (!%p698_p13), %vm512_vm10, 16843009, %v860_v12  ;;  %v505_v19 = vld [vmem:[#allocation5 + $0x8] sm:$0xff] (!%p698_p13)  ;;  %vm547_vm14 = vcmask (!%p698_p13), 122880  }
 0x1c0   : > { %v529_v21 = vunpack.c.0.s8 (!%p698_p13), %v527_v13  ;;  %v530_v22 = vunpack.c.0.s8 (!%p698_p13), %v528_v14  ;;  %v524_v40 = vld [vmem:[#allocation2 + $0x5] sm:$0x1] (!%p698_p13) }
 0x1c2   : > { %vm531_vm11 = vcmp.ne.s32.totalorder (!%p698_p13), %v529_v21, 0  ;;  %vm532_vm12 = vcmp.ne.s32.totalorder (!%p698_p13), %v530_v22, 0 }
 0x1c3   : > { %v514_v15 = vstv (!%p698_p13), %s513_s18  ;;  %v518_v20 = vstv (!%p698_p13), %s699_s19 }
 0x1c4   : > { %v515_v16 = vmul.f32 (!%p698_p13), %v514_v15, %v501_v10  ;;  %v516_v17 = vmul.f32 (!%p698_p13), %v514_v15, %v502_v11 }
 0x1c6   : > { %v519_v23 = vadd.f32 %v518_v20, %v515_v16  ;;  %v520_v24 = vadd.f32 %v518_v20, %v516_v17 }
 0x1c8   : > { %v521_v25 = vsub.f32 %v519_v23, %v504_v18  ;;  %v522_v26 = vsub.f32 %v520_v24, %v505_v19 }
 0x1ca   : > { %v525_v27 = vand.u32 2147483647, %v521_v25  ;;  %v526_v28 = vand.u32 2147483647, %v522_v26 }
 0x1cc   : > { %v533_v29 = vsel %vm531_vm11, %v525_v27, 0.0  ;;  %v534_v30 = vsel %vm532_vm12, %v526_v28, 0.0 }
 0x1cd   : > { %v536_v31 = vsel %vm535_vm13, %v533_v29, 0.0  ;;  %v537_v32 = vsel %vm535_vm13, %v534_v30, 0.0 }
 0x1ce   : > { %v538_v33 = vadd.f32 %v537_v32, %v536_v31 }
 0x1d0   : > { %v539_v34 = vsel %vm535_vm13, %v538_v33, 0.0 }
 0x1d1   : > { %v540_v35 = vrot.slane %v539_v34, 4 }
 0x1d3   : > { %v541_v36 = vadd.f32 %v540_v35, %v539_v34 }
 0x1d5   : > { %v542_v37 = vrot.slane %v541_v36, 2 }
 0x1d7   : > { %v543_v38 = vadd.f32 %v542_v37, %v541_v36 }
 0x1d9   : > { %v544_v39 = vrot.slane %v543_v38, 1 }
 0x1db   : > { %v545_v41 = vadd.f32 %v544_v39, %v543_v38 }
 0x1dd   : > { %v546_v42 = vadd.f32 %v545_v41, %v524_v40 }
 0x1df   : > { %548 = vst.msk [vmem:[#allocation2 + $0x5] sm:$0x1] %vm547_vm14, %v546_v42 }
 0x1e0 PF: > { %552 = sbr.rel (!%p495_p12) target bundleno = 751 (0x2ef), region = 56  ;;  %v554_v43 = vld [vmem:[#allocation2 + $0x2] sm:$0x1] (%p495_p12)  ;;  %vm555_vm15 = vcmask (%p495_p12), 122880  }
 0x1e1   : > { %v556_v45 = vsel (%p495_p12), %vm555_vm15, %v554_v43, 0.0 }
 0x1e2   : > { %557 = vadd.xlane.f32.xlu0 (%p495_p12), %v556_v45 }
 0x1e6   : > { %v567_v44 = vld [vmem:[#allocation2 + $0x5] sm:$0x1] (%p495_p12) }
 0x1e7   : > { %v568_v46 = vsel %vm555_vm15, %v567_v44, 0.0 }
 0x1e8   : > { %569 = vadd.xlane.f32.xlu0 %v568_v46 }
 0x26f   : > { %v558_v47 = vpop.xlane.xlu0 %557 }
 0x270   : > { %v559_v48 = vrot.slane %v558_v47, 4 }
 0x272   : > { %v560_v49 = vadd.f32 %v559_v48, %v558_v47 }
 0x274   : > { %v561_v51 = vrot.slane %v560_v49, 2 }
 0x275   : > { %v570_v50 = vpop.xlane.xlu0 %569 }
 0x276   : > { %v571_v52 = vrot.slane %v570_v50, 4  ;;  %v562_v53 = vadd.f32 %v561_v51, %v560_v49 }
 0x278   : > { %v572_v54 = vadd.f32 %v571_v52, %v570_v50  ;;  %v563_v55 = vrot.slane %v562_v53, 1 }
 0x27a   : > { %v573_v56 = vrot.slane %v572_v54, 2  ;;  %v564_v57 = vadd.f32 %v563_v55, %v562_v53 }
 0x27c   : > { %v574_v58 = vadd.f32 %v573_v56, %v572_v54  ;;  %721 = vpush %v564_v57 }
 0x27e   : > { %v575_v59 = vrot.slane %v574_v58, 1 }
 0x280   : > { %v576_v60 = vadd.f32 %v575_v59, %v574_v58 }
 0x282   : > { %723 = vpush %v576_v60 }
 0x2ad   : > { %s722_s12 = spop %721 }
 0x2ae   : > { %v578_v61 = vstv %s722_s12 }
 0x2af   : > { %780 = vrcp.f32 %v578_v61 }
 0x2b3   : > { %s724_s20 = spop %723 }
 0x2b9   : > { %v781_v62 = vpop.eup %780 }
 0x2ba   : > { %725 = vpush %v781_v62 }
 0x2eb   : > { %s726_s21 = spop %725 }
 0x2ec   : > { %s581_s22 = smul.f32 %s726_s21, %s724_s20 }
 0x2ee   : > { %583 = sst [smem:[#allocation10]] %s581_s22 }
 0x2ef PF: > { %p742_p0 = scmp.eq.s32.totalorder %s685_s15, 1  ;;  %s810_s25 = scalar_lea.hbm %s1037_s3, 16 }
 0x2f0   : > { %p811_p1 = scmp.ne.s32.totalorder %s1037_s3, %s810_s25  ;;  %p816_p8 = scmp.lt.u32.totalorder %s810_s25, %s1037_s3 }
 0x2f2   : > { %p812_p2 = pnand %p811_p1, %p742_p0 }
 0x2f4   : > { %p813_p6 = pneg %p812_p2 }
 0x2f6   : > { %p818_p7 = pnand %p816_p8, %p813_p6 }
 0x2f8   : > { %821 = shalt.err (!%p818_p7)
}
 0x2f9   : > { %s861_s30 = smov [#allocation10]  }
 0x2fa   : > { %732 = dma.smem_to_hbm (%p742_p0), %s861_s30, 16, %s1037_s3, [#allocation9]  }
 0x2fb   : > { %839 = dma.done.wait (%p742_p0), [#allocation9], 16  }
 0x2fc   : > { %841 = vsyncadd (%p742_p0), [#allocation9], 4294967280 }
 0x2fd   : > { %597 = sfence }
 0x2fe PF: > { %s17_s14 = sadd.s32 1, %s852_s14   ;;  %s1044_s12 = smov %s848_s13 }
 0x2ff   : > { %p14_p9 = scmp.ge.s32.totalorder %s17_s14, 4   ;;  %s1045_s13 = smov %s1047_s16 }
 0x301   :  { %16 = sbr.rel (!%p14_p9) target bundleno = 4 (0x4), region = 115 }
 0x308   :  { %603 = vsyncpa [#allocation8], 1 }
 0x309   :  { %605 = vsyncpa [#allocation8 + $0x1], 1 }
 0x30a   :  { %606 = vsyncpa [#allocation9], 1 }
 0x30b   :  { %608 = vsyncpa [#allocation9 + $0x1], 1 }

</bundles_post_ra>
